<compile_context>
chip_gen: v5e
topology: v5e:2x2
jax: 0.10.0
libtpu: 0.0.40
codegen_flags: <defaults>
</compile_context>

<pallas_src>
import functools

import jax
import jax.numpy as jnp
from jax.experimental import pallas as pl
from jax.experimental.pallas import tpu as pltpu

LANE = 128
SUBLANE = 8          # f32 sublane tile
DEFAULT_TILE_B = 512  # batch lanes per grid step (2 * n_pad * TILE_B * 4B << VMEM on all gens)


def _noisy_or_kernel(lam0_ref, lam_ref, x_ref, y_ref, out_ref):
    # lam0_ref: (1, 1) SMEM   -> log(1 - sigmoid(lambda_0_param))   (precomputed)
    # lam_ref:  (n_pad, 1)    -> log(1 - sigmoid(lambdas_param))    (precomputed, padded rows = 0)
    # x_ref:    (n_pad, TILE_B) parent values (0/1 f32), padded rows/lanes are 0
    # y_ref:    (1, TILE_B)     observed outcome (0/1 f32)
    # out_ref:  (1, TILE_B)     log-probability output (lane-dense)
    log1m_lam0 = lam0_ref[0, 0]                       # scalar
    log1m_lam = lam_ref[...]                          # (n_pad, 1)
    x = x_ref[...]                                    # (n_pad, TILE_B)

    # x is binary: (1 - lam)^x == exp(x * log(1 - lam)).  Sum over parents in
    # log space (pure VPU multiply + XLU sublane reduce, zero transcendentals
    # per element).  Padded parent rows have x == 0 -> contribute 0.
    sum_parents = jnp.sum(x * log1m_lam, axis=0, keepdims=True)   # (1, TILE_B)
    log_prod = log1m_lam0 + sum_parents                            # (1, TILE_B)

    prod = jnp.exp(log_prod)                                       # (1, TILE_B)
    y = y_ref[...]                                                 # (1, TILE_B)
    # y == 1 -> log(1 - prod) = log1p(-exp(log_prod)) ; y == 0 -> log(prod) = log_prod
    out_ref[...] = jnp.where(y == 1.0, jnp.log1p(-prod), log_prod)


def _round_up(v, m):
    return ((v + m - 1) // m) * m


@functools.partial(jax.jit, static_argnames=("tile_b",))
def noisy_or_forward(x, y, lambda_0_param, lambdas_param, tile_b=DEFAULT_TILE_B):
    """x: (B, n) 0/1 floats, y: (B,) 0/1 floats, lambda_0_param: (1,), lambdas_param: (n,).

    Returns log_p of shape (B,), matching the PyTorch NoisyOr.forward().
    """
    B, n = x.shape
    n_pad = _round_up(max(n, SUBLANE), SUBLANE)

    if B <= tile_b:
        B_pad = _round_up(max(B, LANE), LANE)
        tile_b = B_pad                      # single tile
    else:
        B_pad = _round_up(B, tile_b)

    # Transposed, lane-dense layout.  Padded parent rows and padded batch lanes
    # are 0 (x=0 contributes a factor of 1; padded lanes are sliced off below).
    x_t = jnp.pad(x.astype(jnp.float32).T, ((0, n_pad - n), (0, B_pad - B)))     # (n_pad, B_pad)
    y_t = jnp.pad(y.astype(jnp.float32).reshape(1, B), ((0, 0), (0, B_pad - B)))  # (1, B_pad)

    # Precompute log(1 - sigmoid(z)) = log_sigmoid(-z) once, outside the kernel.
    lam_log1m = jnp.pad(
        jax.nn.log_sigmoid(-lambdas_param.astype(jnp.float32)), (0, n_pad - n)
    ).reshape(n_pad, 1)                                                           # (n_pad, 1)
    lam0_log1m = jax.nn.log_sigmoid(-lambda_0_param.astype(jnp.float32)).reshape(1, 1)

    out = pl.pallas_call(
        _noisy_or_kernel,
        out_shape=jax.ShapeDtypeStruct((1, B_pad), jnp.float32),
        grid=(B_pad // tile_b,),
        in_specs=[
            pl.BlockSpec(memory_space=pltpu.SMEM),                 # log(1 - lambda_0) scalar
            pl.BlockSpec((n_pad, 1), lambda i: (0, 0)),            # log(1 - lambdas) column
            pl.BlockSpec((n_pad, tile_b), lambda i: (0, i)),       # x tile (parents x batch)
            pl.BlockSpec((1, tile_b), lambda i: (0, i)),           # y tile (lane-dense)
        ],
        out_specs=pl.BlockSpec((1, tile_b), lambda i: (0, i)),     # lane-dense output
        compiler_params=pltpu.CompilerParams(
            dimension_semantics=("parallel",),
        ),
    )(lam0_log1m, lam_log1m, x_t, y_t)

    return out[0, :B]


def noisy_or_ref(x, y, lambda_0_param, lambdas_param):
    """Pure-JAX reference matching the PyTorch forward exactly."""
    lam0 = jax.nn.sigmoid(lambda_0_param)[0]
    lam = jax.nn.sigmoid(lambdas_param)
    prod = (1.0 - lam0) * jnp.prod((1.0 - lam) ** x, axis=1)
    return jnp.where(y == 1.0, jnp.log(1.0 - prod), jnp.log(prod))


if __name__ == "__main__":
    key = jax.random.PRNGKey(0)
    k0, k1, k2, k3, k4, k5 = jax.random.split(key, 6)

    n_parents = 4

    # Deterministic parameter init (matches torch.rand(...) shapes / range).
    lambda_0 = jax.random.uniform(k0, (1,), jnp.float32)
    lambdas = jax.random.uniform(k1, (n_parents,), jnp.float32)

    # Small batch (single grid step, padded to 128 lanes inside the wrapper).
    batch = 6
    x_small = jax.random.bernoulli(k2, 0.5, (batch, n_parents)).astype(jnp.float32)
    y_small = jax.random.bernoulli(k3, 0.5, (batch,)).astype(jnp.float32)

    out_small = jax.block_until_ready(noisy_or_forward(x_small, y_small, lambda_0, lambdas))
    ref_small = noisy_or_ref(x_small, y_small, lambda_0, lambdas)
    assert out_small.shape == (batch,)
    assert jnp.allclose(out_small, ref_small, atol=1e-5, rtol=1e-5), (out_small, ref_small)

    # Larger batch (exercises multiple grid steps with 512-lane tiles).
    big_batch = 1000
    x_big = jax.random.bernoulli(k4, 0.5, (big_batch, n_parents)).astype(jnp.float32)
    y_big = jax.random.bernoulli(k5, 0.5, (big_batch,)).astype(jnp.float32)

    out_big = jax.block_until_ready(noisy_or_forward(x_big, y_big, lambda_0, lambdas))
    ref_big = noisy_or_ref(x_big, y_big, lambda_0, lambdas)
    assert out_big.shape == (big_batch,)
    assert jnp.allclose(out_big, ref_big, atol=1e-5, rtol=1e-5)

    print("KERNEL_OK")
</pallas_src>

<mosaic_0001>
module attributes {stable_mosaic.version = 11 : i64} {
  func.func @_noisy_or_kernel(%arg0: i32, %arg1: memref<1x1xf32, #tpu.memory_space<smem>>, %arg2: memref<8x1xf32, #tpu.memory_space<vmem>>, %arg3: memref<8x128xf32, #tpu.memory_space<vmem>>, %arg4: memref<1x128xf32, #tpu.memory_space<vmem>>, %arg5: memref<1x128xf32, #tpu.memory_space<vmem>>) attributes {dimension_semantics = [#tpu.dimension_semantics<parallel>], iteration_bounds = array<i64: 1>, scalar_prefetch = 0 : i64, scratch_operands = 0 : i64, tpu.core_type = #tpu.core_type<tc>, window_params = [{transform_indices = @transform_0, window_bounds = array<i64: 1, 1>}, {pipeline_mode = #tpu.pipeline_mode<synchronous>, transform_indices = @transform_1, window_bounds = array<i64: 8, 1>}, {transform_indices = @transform_2, window_bounds = array<i64: 8, 128>}, {transform_indices = @transform_3, window_bounds = array<i64: 1, 128>}, {transform_indices = @transform_4, window_bounds = array<i64: 1, 128>}]} {
    %c0 = arith.constant 0 : index
    %c0_0 = arith.constant 0 : index
    %0 = memref.load %arg1[%c0, %c0_0] : memref<1x1xf32, #tpu.memory_space<smem>>
    %c0_1 = arith.constant 0 : index
    %c0_2 = arith.constant 0 : index
    %1 = vector.load %arg2[%c0_1, %c0_2] : memref<8x1xf32, #tpu.memory_space<vmem>>, vector<8x1xf32>
    %c0_3 = arith.constant 0 : index
    %c0_4 = arith.constant 0 : index
    %2 = vector.load %arg3[%c0_3, %c0_4] : memref<8x128xf32, #tpu.memory_space<vmem>>, vector<8x128xf32>
    %3 = vector.broadcast %1 : vector<8x1xf32> to vector<8x128xf32>
    %4 = arith.mulf %2, %3 : vector<8x128xf32>
    %cst = arith.constant dense<0.000000e+00> : vector<128xf32>
    %5 = vector.multi_reduction <add>, %4, %cst [0] : vector<8x128xf32> to vector<128xf32>
    %6 = vector.shape_cast %5 : vector<128xf32> to vector<1x128xf32>
    %7 = vector.broadcast %0 : f32 to vector<1x128xf32>
    %8 = arith.addf %7, %6 : vector<1x128xf32>
    %9 = math.exp %8 : vector<1x128xf32>
    %c0_5 = arith.constant 0 : index
    %c0_6 = arith.constant 0 : index
    %10 = vector.load %arg4[%c0_5, %c0_6] : memref<1x128xf32, #tpu.memory_space<vmem>>, vector<1x128xf32>
    %cst_7 = arith.constant 1.000000e+00 : f32
    %11 = vector.broadcast %cst_7 : f32 to vector<1x128xf32>
    %12 = arith.cmpf oeq, %10, %11 : vector<1x128xf32>
    %cst_8 = arith.constant 0.000000e+00 : f32
    %13 = vector.broadcast %cst_8 : f32 to vector<1x128xf32>
    %14 = arith.subf %13, %9 : vector<1x128xf32>
    %15 = math.log1p %14 : vector<1x128xf32>
    %16 = arith.select %12, %15, %8 : vector<1x128xi1>, vector<1x128xf32>
    %c0_9 = arith.constant 0 : index
    %c0_10 = arith.constant 0 : index
    %17 = vector.load %arg5[%c0_9, %c0_10] : memref<1x128xf32, #tpu.memory_space<vmem>>, vector<1x128xf32>
    tpu.vector_store %arg5[%c0_9, %c0_10], %16 {strides = array<i32>} : memref<1x128xf32, #tpu.memory_space<vmem>>, vector<1x128xf32>,
    return
  }
  func.func @transform_0(%arg0: i32) -> (i32, i32) {
    %c0_i32 = arith.constant 0 : i32
    %c0_i32_0 = arith.constant 0 : i32
    %c0_i32_1 = arith.constant 0 : i32
    return %c0_i32, %c0_i32_0 : i32, i32
  }
  func.func @transform_1(%arg0: i32) -> (i32, i32) {
    %c0_i32 = arith.constant 0 : i32
    %c0_i32_0 = arith.constant 0 : i32
    %c0_i32_1 = arith.constant 0 : i32
    return %c0_i32, %c0_i32_0 : i32, i32
  }
  func.func @transform_2(%arg0: i32) -> (i32, i32) {
    %c0_i32 = arith.constant 0 : i32
    %c0_i32_0 = arith.constant 0 : i32
    return %c0_i32, %arg0 : i32, i32
  }
  func.func @transform_3(%arg0: i32) -> (i32, i32) {
    %c0_i32 = arith.constant 0 : i32
    %c0_i32_0 = arith.constant 0 : i32
    return %c0_i32, %arg0 : i32, i32
  }
  func.func @transform_4(%arg0: i32) -> (i32, i32) {
    %c0_i32 = arith.constant 0 : i32
    %c0_i32_0 = arith.constant 0 : i32
    return %c0_i32, %arg0 : i32, i32
  }
}

</mosaic_0001>

<bundles_post_ra>
// kernel: noisy_or_forward.1
= control target key start
LH: loop header
LB: loop body
LE: loop exit
PB: predicated region body
PF: predicated region fallthrough
CT: control target
= control target key end

     0   :  { %v61_v0 = vmov 0   ;;  %s102_s1 = inlined_call_operand.vmem [shape: f32[8,1], index: 1, kind: input, shape index: {}]   ;;  %s103_s2 = inlined_call_operand.vmem [shape: f32[8,128], index: 2, kind: input, shape index: {}]   ;;  %s104_s0 = inlined_call_operand.<no memory space> [shape: f32[1,1], index: 0, kind: input, shape index: {}]   ;;  %s105_s3 = inlined_call_operand.vmem [shape: f32[1,128], index: 3, kind: input, shape index: {}]   ;;  %s106_s4 = inlined_call_operand.vmem [shape: f32[1,128], index: 4, kind: output, shape index: {}]  }
   0x1   :  { %56 = vset.pattern.permute.xlu0 %v61_v0  ;;  %v19_v1 = vld [vmem:[%s102_s1] sm:$0xff]  ;;  %v33_v10 = vstv %s104_s0 }
   0x2   :  { %23 = vperm.xlu0 %56, %v19_v1   ;;  %v20_v2 = vld [vmem:[%s103_s2] sm:$0xff] }
   0x3   :  { %v37_v19 = vld [vmem:[%s105_s3] sm:$0x1] }
   0x4   :  { %vm38_vm0 = vcmp.eq.f32.partialorder %v37_v19, 1.0 }
  0x74   :  { %v24_v3 = vpop.permute.xlu0 %23 }
  0x75   :  { %v26_v4 = vmul.f32 %v24_v3, %v20_v2 }
  0x77   :  { %v27_v5 = vrot.slane %v26_v4, 4 }
  0x79   :  { %v28_v6 = vadd.f32 %v27_v5, %v26_v4 }
  0x7b   :  { %v29_v7 = vrot.slane %v28_v6, 2 }
  0x7d   :  { %v30_v8 = vadd.f32 %v29_v7, %v28_v6 }
  0x7f   :  { %v31_v9 = vrot.slane %v30_v8, 1 }
  0x81   :  { %v32_v11 = vadd.f32 %v31_v9, %v30_v8 }
  0x83   :  { %v34_v12 = vadd.f32 %v33_v10, %v32_v11 }
  0x85   :  { %v35_v13 = vmul.f32 1.442695, %v34_v12 }
  0x87   :  { %57 = vpow2.f32 %v35_v13 }
  0x8d   :  { %v58_v14 = vpop.eup %57 }
  0x8e   :  { %v39_v15 = vsub.f32 0.0, %v58_v14 }
  0x90   :  { %v40_v16 = vadd.f32 1.0, %v39_v15  ;;  %v43_v17 = vmul.f32 -0.5, %v39_v15  ;;  %v46_v20 = vand.u32 2147483647, %v39_v15 }
  0x92   :  { %59 = vlog2.f32 %v40_v16  ;;  %v44_v18 = vadd.f32 1.0, %v43_v17  ;;  %vm47_vm1 = vcmp.lt.f32.partialorder %v46_v20, 0.0004427343 }
  0x94   :  { %v45_v23 = vmul.f32 %v44_v18, %v39_v15 }
  0x98   :  { %v60_v21 = vpop.eup %59 }
  0x99   :  { %v42_v22 = vmul.f32 0.6931472, %v60_v21 }
  0x9b   :  { %v48_v24 = vsel %vm47_vm1, %v45_v23, %v42_v22 }
  0x9c   :  { %v49_v25 = vsel %vm38_vm0, %v48_v24, %v34_v12 }
  0x9d   :  { %50 = vst [vmem:[%s106_s4] sm:$0x1] %v49_v25 }

</bundles_post_ra>
